<compile_context>
chip_gen: v7x
topology: tpu7x:2x2x1
jax: 0.10.0
libtpu: 0.0.40
codegen_flags: <defaults>
</compile_context>

<pallas_src>
import functools
import math

import jax
import jax.numpy as jnp
from jax import lax
from jax.experimental import pallas as pl
from jax.experimental.pallas import tpu as pltpu


def _round_up(x, m):
    return ((x + m - 1) // m) * m


def _pad2d(a, rows, cols):
    return jnp.pad(a, ((0, rows - a.shape[0]), (0, cols - a.shape[1])))


# --------------------------- fused tiled matmul -----------------------------


def _mm_kernel(*refs, has_bias, bn, relu, n_rows, eps):
    idx = 0
    a_ref = refs[idx]; idx += 1
    b_ref = refs[idx]; idx += 1
    bias_ref = gamma_ref = beta_ref = None
    if has_bias:
        bias_ref = refs[idx]; idx += 1
    if bn:
        gamma_ref = refs[idx]; beta_ref = refs[idx + 1]; idx += 2
    o_ref = refs[idx]; idx += 1
    acc_ref = refs[idx]

    k = pl.program_id(2)

    @pl.when(k == 0)
    def _init():
        acc_ref[...] = jnp.zeros_like(acc_ref)

    acc_ref[...] += jnp.dot(a_ref[...], b_ref[...],
                            preferred_element_type=jnp.float32)

    @pl.when(k == pl.num_programs(2) - 1)
    def _epilogue():
        acc = acc_ref[...]
        if has_bias:
            acc = acc + bias_ref[...]                       # (1, tn) broadcast
        if bn:
            # BatchNorm1d (training mode, biased batch stats) over the first
            # n_rows valid rows; padded rows are masked out of the statistics.
            rows = lax.broadcasted_iota(jnp.int32, acc.shape, 0)
            valid = (rows < n_rows).astype(jnp.float32)
            cnt = float(n_rows)
            mean = jnp.sum(acc * valid, axis=0, keepdims=True) / cnt
            diff = (acc - mean) * valid
            var = jnp.sum(diff * diff, axis=0, keepdims=True) / cnt
            acc = (acc - mean) * lax.rsqrt(var + eps) * gamma_ref[...] + beta_ref[...]
        if relu:
            acc = jnp.maximum(acc, 0.0)
        o_ref[...] = acc.astype(o_ref.dtype)


def fused_matmul(a, b, bias=None, relu=False, bn=None, out_dtype=jnp.bfloat16,
                 tm=256, tn=256, tk=512):
    """out = a @ b (+ bias) (+ BatchNorm over the M valid rows) (+ ReLU).

    Inputs are zero-padded to lane/sublane-aligned tiles and fed to the MXU in
    bf16 with f32 accumulation. Returns the PADDED (Mp, Np) result; callers slice.
    `a` may have more columns than b has rows iff the extra columns are zeros.
    """
    M, Ka = a.shape
    Kb, N = b.shape
    assert Ka >= Kb, "extra trailing columns of `a` must be zero padding"

    if bn is not None:
        tm = _round_up(M, 8)            # BN stats need the whole batch in one M tile
    else:
        tm = min(tm, _round_up(M, 8))
    tn = min(tn, _round_up(N, 128))
    tk = min(tk, _round_up(Ka, 128))
    Mp, Np, Kp = _round_up(M, tm), _round_up(N, tn), _round_up(Ka, tk)

    a_p = _pad2d(a, Mp, Kp).astype(jnp.bfloat16)
    b_p = _pad2d(b, Kp, Np).astype(jnp.bfloat16)

    inputs = [a_p, b_p]
    in_specs = [pl.BlockSpec((tm, tk), lambda i, j, k: (i, k)),
                pl.BlockSpec((tk, tn), lambda i, j, k: (k, j))]
    if bias is not None:
        inputs.append(_pad2d(bias.reshape(1, N).astype(jnp.float32), 1, Np))
        in_specs.append(pl.BlockSpec((1, tn), lambda i, j, k: (0, j)))
    if bn is not None:
        gamma, beta, eps = bn
        inputs.append(_pad2d(gamma.reshape(1, N).astype(jnp.float32), 1, Np))
        inputs.append(_pad2d(beta.reshape(1, N).astype(jnp.float32), 1, Np))
        in_specs.append(pl.BlockSpec((1, tn), lambda i, j, k: (0, j)))
        in_specs.append(pl.BlockSpec((1, tn), lambda i, j, k: (0, j)))
    else:
        eps = 0.0

    kernel = functools.partial(_mm_kernel, has_bias=bias is not None,
                               bn=bn is not None, relu=relu,
                               n_rows=M, eps=float(eps))
    out_bytes = jnp.dtype(out_dtype).itemsize
    out = pl.pallas_call(
        kernel,
        out_shape=jax.ShapeDtypeStruct((Mp, Np), out_dtype),
        grid=(Mp // tm, Np // tn, Kp // tk),
        in_specs=in_specs,
        out_specs=pl.BlockSpec((tm, tn), lambda i, j, k: (i, j)),
        scratch_shapes=[pltpu.VMEM((tm, tn), jnp.float32)],
        compiler_params=pltpu.CompilerParams(
            dimension_semantics=("parallel", "parallel", "arbitrary"),
            vmem_limit_bytes=64 * 1024 * 1024),
        cost_estimate=pl.CostEstimate(
            flops=2 * Mp * Np * Kp,
            transcendentals=0,
            bytes_accessed=2 * Mp * Kp + 2 * Kp * Np + out_bytes * Mp * Np),
    )(*inputs)
    return out                                  # padded (Mp, Np)


# ---------------------- maxpool2x2 + global avg pool ------------------------


def _pool_kernel(x_ref, o_ref, acc_ref, *, hb, W, inv_count):
    t = pl.program_id(1)

    @pl.when(t == 0)
    def _init():
        acc_ref[...] = jnp.zeros_like(acc_ref)

    C = x_ref.shape[-1]
    x = x_ref[...].astype(jnp.float32).reshape(hb, 2 * W, C)   # (pooled rows, 2 img rows x W, C)
    v = jnp.maximum(x[:, :W, :], x[:, W:, :])                  # vertical 2x1 max  (hb, W, C)
    v = v.reshape(hb * (W // 2), 2, C)                         # adjacent-w pairs
    m = jnp.max(v, axis=1)                                     # horizontal 1x2 max
    acc_ref[...] += jnp.sum(m, axis=0, keepdims=True)          # running GAP sum (1, C)

    @pl.when(t == pl.num_programs(1) - 1)
    def _store():
        o_ref[...] = (acc_ref[...] * inv_count).reshape(1, 1, C).astype(o_ref.dtype)


def maxpool_gap(feat2d, B, H, W):
    """2x2/stride-2 maxpool + global average pool over NHWC-flattened conv rows."""
    BHW, C = feat2d.shape
    assert BHW == B * H * W and H % 2 == 0 and W % 2 == 0
    Hp, Wp = H // 2, W // 2
    hb = None
    for cand in range(min(Hp, 4), 0, -1):            # pooled rows handled per tile
        if Hp % cand == 0 and (2 * cand * W) % 8 == 0:
            hb = cand
            break
    assert hb is not None, "need an 8-aligned row tile"
    T = Hp // hb
    rows = 2 * hb * W
    out = pl.pallas_call(
        functools.partial(_pool_kernel, hb=hb, W=W, inv_count=1.0 / (Hp * Wp)),
        out_shape=jax.ShapeDtypeStruct((B, 1, C), jnp.bfloat16),
        grid=(B, T),
        in_specs=[pl.BlockSpec((rows, C), lambda b, t: (b * T + t, 0))],
        out_specs=pl.BlockSpec((1, 1, C), lambda b, t: (b, 0, 0)),
        scratch_shapes=[pltpu.VMEM((1, C), jnp.float32)],
        compiler_params=pltpu.CompilerParams(
            dimension_semantics=("parallel", "arbitrary")),
    )(feat2d)
    return out.reshape(B, C)


# --------------------------- NT-Xent (online LSE) ---------------------------


def _ntxent_kernel(zr_ref, zc_ref, out_ref, m_scr, l_scr, p_scr,
                   *, n, half, tr, tc, inv_sqrt_tau):
    i = pl.program_id(0)
    j = pl.program_id(1)

    @pl.when(j == 0)
    def _init():
        m_scr[...] = jnp.full_like(m_scr, -jnp.inf)
        l_scr[...] = jnp.zeros_like(l_scr)
        p_scr[...] = jnp.zeros_like(p_scr)

    def norm(z):                                    # F.normalize (eps clamp) / sqrt(tau)
        nrm = jnp.sqrt(jnp.sum(z * z, axis=1, keepdims=True))
        return z / jnp.maximum(nrm, 1e-12) * inv_sqrt_tau

    zr = norm(zr_ref[...].astype(jnp.float32))
    zc = norm(zc_ref[...].astype(jnp.float32))
    logits = lax.dot_general(zr, zc, (((1,), (1,)), ((), ())),
                             preferred_element_type=jnp.float32)   # (tr, tc) f32

    grow = i * tr + lax.broadcasted_iota(jnp.int32, (tr, tc), 0)
    gcol = j * tc + lax.broadcasted_iota(jnp.int32, (tr, tc), 1)
    logits = jnp.where((grow == gcol) | (gcol >= n), -1.0e9, logits)

    label = jnp.where(grow < n, (grow + half) % n, -1)   # positive column (multiplier=2)
    p_scr[...] += jnp.sum(jnp.where(gcol == label, logits, 0.0),
                          axis=1, keepdims=True)

    m_new = jnp.maximum(m_scr[...], jnp.max(logits, axis=1, keepdims=True))
    l_scr[...] = (l_scr[...] * jnp.exp(m_scr[...] - m_new)
                  + jnp.sum(jnp.exp(logits - m_new), axis=1, keepdims=True))
    m_scr[...] = m_new

    @pl.when(j == pl.num_programs(1) - 1)
    def _store():
        lse = m_scr[...] + jnp.log(l_scr[...])
        row_loss = lse - p_scr[...]                          # = -logprob[row, label]
        rvalid = (i * tr + lax.broadcasted_iota(jnp.int32, (tr, 1), 0)) < n
        out_ref[...] = jnp.where(rvalid, row_loss, 0.0)


def nt_xent_loss(x_proj, y_proj, tau=1.0, mult=2):
    # TODO(synk): pass x_proj / y_proj as two separate BlockSpec inputs to drop this
    #             concatenate; only multiplier=2 labels are implemented.
    assert mult == 2
    z = jnp.concatenate([x_proj, y_proj], axis=0).astype(jnp.float32)
    n, D = z.shape
    assert n % mult == 0
    tr = min(128, _round_up(n, 8))
    tc = tr
    n_pad = _round_up(n, tr)
    Dp = _round_up(D, 128)
    zp = _pad2d(z, n_pad, Dp)
    per_row = pl.pallas_call(
        functools.partial(_ntxent_kernel, n=n, half=n // mult, tr=tr, tc=tc,
                          inv_sqrt_tau=1.0 / math.sqrt(tau)),
        out_shape=jax.ShapeDtypeStruct((n_pad, 1), jnp.float32),
        grid=(n_pad // tr, n_pad // tc),
        in_specs=[pl.BlockSpec((tr, Dp), lambda i, j: (i, 0)),
                  pl.BlockSpec((tc, Dp), lambda i, j: (j, 0))],
        out_specs=pl.BlockSpec((tr, 1), lambda i, j: (i, 0)),
        scratch_shapes=[pltpu.VMEM((tr, 1), jnp.float32),
                        pltpu.VMEM((tr, 1), jnp.float32),
                        pltpu.VMEM((tr, 1), jnp.float32)],
        compiler_params=pltpu.CompilerParams(
            dimension_semantics=("parallel", "arbitrary")),
        cost_estimate=pl.CostEstimate(
            flops=2 * n_pad * n_pad * Dp,
            transcendentals=n_pad * n_pad,
            bytes_accessed=2 * n_pad * Dp * 4 + n_pad * 4),
    )(zp, zp)
    return jnp.sum(per_row) / (n * (mult - 1))


# ------------------------------- model stages -------------------------------


def backbone(x_nchw, params):
    """Conv3x3(p=1)+ReLU -> maxpool2x2 -> global-avg-pool -> flatten (ResNet-ish stem)."""
    B, Cin, H, W = x_nchw.shape
    x = jnp.transpose(x_nchw, (0, 2, 3, 1)).astype(jnp.bfloat16)   # NCHW -> NHWC, bf16
    # TODO(synk): replace the 9x im2col materialization with an implicit-GEMM conv
    #             (K-loop over the 3x3 taps via element-offset index maps).
    xp = jnp.pad(x, ((0, 0), (1, 1), (1, 1), (0, 0)))
    cols = [xp[:, di:di + H, dj:dj + W, :] for di in range(3) for dj in range(3)]
    patches = jnp.stack(cols, axis=3).reshape(B * H * W, 9 * Cin)   # bf16 patches

    w = params["conv_w"]                                 # torch layout (Cout, Cin, 3, 3)
    wm = jnp.transpose(w, (2, 3, 1, 0)).reshape(9 * Cin, w.shape[0])
    conv = fused_matmul(patches, wm, bias=params["conv_b"], relu=True,
                        out_dtype=jnp.bfloat16)          # rows = B*H*W, lane-padded C
    conv = conv[:B * H * W]                              # drop padded rows, keep lanes
    return maxpool_gap(conv, B, H, W)                    # (B, Cp); padded features are 0


def projector(emb, params, eps=1e-5):
    """Linear -> BatchNorm1d(train) -> ReLU fused in one call, then Linear(bias=False)."""
    # TODO(synk): BatchNorm1d running_mean/var are not tracked (pure forward loss).
    h = fused_matmul(emb, params["w1"], bias=params["b1"], relu=True,
                     bn=(params["bn_g"], params["bn_b"], eps),
                     out_dtype=jnp.bfloat16)
    return fused_matmul(h, params["w2"], bias=None, relu=False,
                        out_dtype=jnp.float32)


def simclr_forward(x, y, params, temp=1.0):
    B = x.shape[0]
    d_out = params["w2"].shape[1]
    zx = projector(backbone(x, params), params)
    zy = projector(backbone(y, params), params)
    return nt_xent_loss(zx[:B, :d_out], zy[:B, :d_out], tau=temp, mult=2)


# ------------------------------------ main -----------------------------------

if __name__ == "__main__":
    key = jax.random.PRNGKey(0)
    ks = jax.random.split(key, 7)

    B, Cin, H, W = 2, 4, 16, 16        # small NCHW inputs
    num_features = 32                  # synthetic backbone embedding dim
    D1, D2 = 64, 64                    # arg_mlp = "64-64" -> spec "32-64-64"

    params = dict(
        conv_w=0.1 * jax.random.normal(ks[0], (num_features, Cin, 3, 3), jnp.float32),
        conv_b=0.1 * jax.random.normal(ks[1], (num_features,), jnp.float32),
        w1=0.1 * jax.random.normal(ks[2], (num_features, D1), jnp.float32),
        b1=0.1 * jax.random.normal(ks[3], (D1,), jnp.float32),
        bn_g=jnp.ones((D1,), jnp.float32),
        bn_b=jnp.zeros((D1,), jnp.float32),
        w2=0.1 * jax.random.normal(ks[4], (D1, D2), jnp.float32),
    )

    x = jax.random.normal(ks[5], (B, Cin, H, W), jnp.float32)
    y = jax.random.normal(ks[6], (B, Cin, H, W), jnp.float32)

    loss = simclr_forward(x, y, params, temp=1.0)
    jax.block_until_ready(loss)
    assert loss.shape == () and jnp.isfinite(loss)
    print("KERNEL_OK")
</pallas_src>

<mosaic_0001>
module attributes {stable_mosaic.version = 11 : i64} {
  func.func @_mm_kernel(%arg0: i32, %arg1: i32, %arg2: i32, %arg3: memref<256x128xbf16, #tpu.memory_space<vmem>>, %arg4: memref<128x128xbf16, #tpu.memory_space<vmem>>, %arg5: memref<1x128xf32, #tpu.memory_space<vmem>>, %arg6: memref<256x128xbf16, #tpu.memory_space<vmem>>, %arg7: memref<256x128xf32, #tpu.memory_space<vmem>>) attributes {dimension_semantics = [#tpu.dimension_semantics<parallel>, #tpu.dimension_semantics<parallel>, #tpu.dimension_semantics<arbitrary>], iteration_bounds = array<i64: 2, 1, 1>, scalar_prefetch = 0 : i64, scratch_operands = 1 : i64, tpu.core_type = #tpu.core_type<tc>, window_params = [{transform_indices = @transform_0, window_bounds = array<i64: 256, 128>}, {transform_indices = @transform_1, window_bounds = array<i64: 128, 128>}, {transform_indices = @transform_2, window_bounds = array<i64: 1, 128>}, {transform_indices = @transform_3, window_bounds = array<i64: 256, 128>}]} {
    %c0_i32 = arith.constant 0 : i32
    %0 = arith.cmpi eq, %arg2, %c0_i32 : i32
    %1 = arith.extui %0 : i1 to i32
    %c0_i32_0 = arith.constant 0 : i32
    %2 = arith.cmpi ne, %1, %c0_i32_0 : i32
    scf.if %2 {
      %cst_10 = arith.constant 0.000000e+00 : f32
      %12 = vector.broadcast %cst_10 : f32 to vector<256x128xf32>
      %c0_11 = arith.constant 0 : index
      %c0_12 = arith.constant 0 : index
      %13 = vector.load %arg7[%c0_11, %c0_12] : memref<256x128xf32, #tpu.memory_space<vmem>>, vector<256x128xf32>
      tpu.vector_store %arg7[%c0_11, %c0_12], %12 {strides = array<i32>} : memref<256x128xf32, #tpu.memory_space<vmem>>, vector<256x128xf32>,
    } else {
    }
    %c0 = arith.constant 0 : index
    %c0_1 = arith.constant 0 : index
    %3 = vector.load %arg7[%c0, %c0_1] : memref<256x128xf32, #tpu.memory_space<vmem>>, vector<256x128xf32>
    %c0_2 = arith.constant 0 : index
    %c0_3 = arith.constant 0 : index
    %4 = vector.load %arg3[%c0_2, %c0_3] : memref<256x128xbf16, #tpu.memory_space<vmem>>, vector<256x128xbf16>
    %c0_4 = arith.constant 0 : index
    %c0_5 = arith.constant 0 : index
    %5 = vector.load %arg4[%c0_4, %c0_5] : memref<128x128xbf16, #tpu.memory_space<vmem>>, vector<128x128xbf16>
    %cst = arith.constant dense<0.000000e+00> : vector<256x128xf32>
    %6 = tpu.matmul %4, %5, %cst {dimension_numbers = #tpu.dot_dimension_numbers<[1], [0], [0], [1], [0, 0, 1, 1], [], []>} : vector<256x128xbf16>, vector<128x128xbf16>, vector<256x128xf32> -> vector<256x128xf32>
    %7 = arith.addf %3, %6 : vector<256x128xf32>
    %c0_6 = arith.constant 0 : index
    %c0_7 = arith.constant 0 : index
    %8 = vector.load %arg7[%c0_6, %c0_7] : memref<256x128xf32, #tpu.memory_space<vmem>>, vector<256x128xf32>
    tpu.vector_store %arg7[%c0_6, %c0_7], %7 {strides = array<i32>} : memref<256x128xf32, #tpu.memory_space<vmem>>, vector<256x128xf32>,
    %c0_i32_8 = arith.constant 0 : i32
    %9 = arith.cmpi eq, %arg2, %c0_i32_8 : i32
    %10 = arith.extui %9 : i1 to i32
    %c0_i32_9 = arith.constant 0 : i32
    %11 = arith.cmpi ne, %10, %c0_i32_9 : i32
    scf.if %11 {
      %c0_10 = arith.constant 0 : index
      %c0_11 = arith.constant 0 : index
      %12 = vector.load %arg7[%c0_10, %c0_11] : memref<256x128xf32, #tpu.memory_space<vmem>>, vector<256x128xf32>
      %c0_12 = arith.constant 0 : index
      %c0_13 = arith.constant 0 : index
      %13 = vector.load %arg5[%c0_12, %c0_13] : memref<1x128xf32, #tpu.memory_space<vmem>>, vector<1x128xf32>
      %14 = vector.broadcast %13 : vector<1x128xf32> to vector<256x128xf32>
      %15 = arith.addf %12, %14 : vector<256x128xf32>
      %cst_14 = arith.constant 0.000000e+00 : f32
      %16 = vector.broadcast %cst_14 : f32 to vector<256x128xf32>
      %17 = arith.maximumf %15, %16 : vector<256x128xf32>
      %18 = arith.truncf %17 : vector<256x128xf32> to vector<256x128xbf16>
      %c0_15 = arith.constant 0 : index
      %c0_16 = arith.constant 0 : index
      %19 = vector.load %arg6[%c0_15, %c0_16] : memref<256x128xbf16, #tpu.memory_space<vmem>>, vector<256x128xbf16>
      tpu.vector_store %arg6[%c0_15, %c0_16], %18 {strides = array<i32>} : memref<256x128xbf16, #tpu.memory_space<vmem>>, vector<256x128xbf16>,
    } else {
    }
    return
  }
  func.func @transform_0(%arg0: i32, %arg1: i32, %arg2: i32) -> (i32, i32) {
    %c0_i32 = arith.constant 0 : i32
    return %arg0, %arg2 : i32, i32
  }
  func.func @transform_1(%arg0: i32, %arg1: i32, %arg2: i32) -> (i32, i32) {
    %c0_i32 = arith.constant 0 : i32
    return %arg2, %arg1 : i32, i32
  }
  func.func @transform_2(%arg0: i32, %arg1: i32, %arg2: i32) -> (i32, i32) {
    %c0_i32 = arith.constant 0 : i32
    %c0_i32_0 = arith.constant 0 : i32
    return %c0_i32, %arg1 : i32, i32
  }
  func.func @transform_3(%arg0: i32, %arg1: i32, %arg2: i32) -> (i32, i32) {
    %c0_i32 = arith.constant 0 : i32
    return %arg0, %arg1 : i32, i32
  }
}

</mosaic_0001>

<bundles_post_ra>
// kernel: tpu_custom_call.1
= control target key start
LH: loop header
LB: loop body
LE: loop exit
PB: predicated region body
PF: predicated region fallthrough
CT: control target
= control target key end

     0   :  { %8 = vsyncpa [#allocation4], 0  ;;  %s2084_s0 = inlined_call_operand.hbm [shape: bf16[512,128], index: 0, kind: input, shape index: {}]   ;;  %s2085_s1 = inlined_call_operand.hbm [shape: bf16[128,128], index: 1, kind: input, shape index: {}]   ;;  %s2086_s2 = inlined_call_operand.hbm [shape: f32[1,128], index: 2, kind: input, shape index: {}]   ;;  %s2087_s3 = inlined_call_operand.hbm [shape: bf16[512,128], index: 3, kind: output, shape index: {}]  }
   0x1   :  { %10 = vsyncpa [#allocation4 + $0x1], 0 }
   0x2   :  { %11 = vsyncpa [#allocation7], 0 }
   0x3   :  { %12 = vsyncpa [#allocation5], 0 }
   0x4   :  { %14 = vsyncpa [#allocation5 + $0x1], 0  ;;  %s1747_s12 = smov 0   ;;  %s1749_s13 = smov 0  }
   0x5   :  { %s1751_s14 = smov 0   ;;  %s1753_s15 = smov 0  }
   0x6   :  { %s1755_s16 = smov 0   ;;  %s1757_s17 = smov 0  }
   0x7 LB: > { %s1141_s18 = sadd.s32 4294967295, %s1717_s17   ;;  %s1142_s19 = sadd.s32 4294967294, %s1717_s17   ;;  %s1717_s17 = sphi %s1757_s17, %s20_s17   ;;  %s1713_s16 = sphi %s1755_s16, %s2109_s16   ;;  %s1709_s15 = sphi %s1753_s15, %s2108_s15   ;;  %s1705_s14 = sphi %s1751_s14, %s2107_s14   ;;  %s1701_s13 = sphi %s1749_s13, %s2106_s13   ;;  %s1697_s12 = sphi %s1747_s12, %s2105_s12  }
   0x8   : > { %p61_p0 = scmp.ne.s32.totalorder %s1701_s13, %s1697_s12  ;;  %p1781_p1 = scmp.eq.s32.totalorder %s1141_s18, 0 }
   0x9   : > { %p1785_p2 = scmp.eq.s32.totalorder %s1141_s18, 1  ;;  %p147_p3 = scmp.eq.s32.totalorder %s1142_s19, 1 }
   0xa   : > { %s2092_s20 = scalar_select %p1781_p1, 1, 0 }
   0xb   : > { %p1791_p4 = por %p1781_p1, %p61_p0  ;;  %p1143_p5 = scmp.ge.s32.totalorder %s1717_s17, 1 }
   0xc   : > { %p1796_p6 = por %p147_p3, %p61_p0  ;;  %p154_p7 = scmp.lt.s32.totalorder %s1717_s17, 3 }
   0xd   : > { %s2094_s22 = scalar_select %p1791_p4, 1, 0 }
   0xe   : > { %s2095_s23 = scalar_select %p1796_p6, 1, 0 }
   0xf   : > { %p1801_p8 = pnand %p1143_p5, %p154_p7  ;;  %s1719_s25 = smov [#allocation6]  }
  0x10   : > { %s170_s26 = sshll.u32 %s1719_s25, 4  ;;  %s1720_s28 = smov [#allocation8]   ;;  %s1805_s26 = int_to_ptr.vmem [resolvable:$true] %s170_s26 }
  0x11   : > { %p1446_p9 = pneg %p1801_p8  ;;  %s186_s29 = sshll.u32 %s1720_s28, 4  ;;  %s1816_s29 = int_to_ptr.vmem [resolvable:$true] %s186_s29 }
  0x12   : > { %s1545_s5 = scalar_lea.hbm %s2085_s1, 1024 }
  0x13   : > { %p1812_p11 = pnand %p1446_p9, %p1781_p1  ;;  %p1546_p12 = scmp.ne.s32.totalorder %s2085_s1, %s1545_s5 }
  0x14   : > { %p1552_p5 = scmp.lt.u32.totalorder %s1545_s5, %s2085_s1 }
  0x15   : > { %p1547_p13 = pneg %p1812_p11 }
  0x17   : > { %p1548_p0 = pnand %p1547_p13, %p1546_p12 }
  0x19   : > { %p1549_p3 = pneg %p1548_p0 }
  0x1b   : > { %p1554_p7 = pnand %p1552_p5, %p1549_p3 }
  0x1d   : > { %1557 = shalt.err (!%p1554_p7)
}
  0x1e   : > { %s1558_s10 = scalar_lea.vmem %s1805_s26, 1024  ;;  %p1566_p1 = scmp.lt.s32.totalorder %s1805_s26, %s1805_s26 }
  0x1f   : > { %p1559_p9 = scmp.ne.s32.totalorder %s1805_s26, %s1558_s10  ;;  %p1567_p12 = scmp.lt.s32.totalorder %s1558_s10, %s1558_s10 }
  0x21   : > { %p1561_p10 = pnand %p1559_p9, %p1547_p13  ;;  %p1568_p0 = por %p1567_p12, %p1566_p1 }
  0x23   : > { %p1562_p6 = pneg %p1561_p10 }
  0x25   : > { %p1569_p4 = pnand %p1568_p0, %p1562_p6 }
  0x27   : > { %1572 = shalt.err (!%p1569_p4)
}
  0x28   : > { %s1721_s11 = smov 64   ;;  %s1722_s18 = smov 4  }
  0x29   : > { %1449 = dma.hbm_to_vmem [thread:$0]  (!%p1812_p11), %s2085_s1, 1024, %s1805_s26, [#allocation7], %s1721_s11, %s1721_s11, %s1722_s18  }
  0x2a   : > { %s1573_s4 = scalar_lea.hbm %s2086_s2, 16 }
  0x2b   : > { %p1574_p1 = scmp.ne.s32.totalorder %s2086_s2, %s1573_s4  ;;  %p1580_p10 = scmp.lt.u32.totalorder %s1573_s4, %s2086_s2 }
  0x2d   : > { %p1576_p4 = pnand %p1574_p1, %p1547_p13 }
  0x2f   : > { %p1577_p6 = pneg %p1576_p4 }
  0x31   : > { %p1582_p3 = pnand %p1580_p10, %p1577_p6 }
  0x33   : > { %1585 = shalt.err (!%p1582_p3)
}
  0x34   : > { %s1586_s26 = scalar_lea.vmem %s1816_s29, 16  ;;  %s1593_s9 = scalar_lea.vmem %s1816_s29, 32 }
  0x35   : > { %p1587_p5 = scmp.ne.s32.totalorder %s1816_s29, %s1586_s26  ;;  %p1594_p12 = scmp.lt.s32.totalorder %s1816_s29, %s1816_s29 }
  0x36   : > { %p1595_p0 = scmp.lt.s32.totalorder %s1593_s9, %s1586_s26 }
  0x37   : > { %p1589_p7 = pnand %p1587_p5, %p1547_p13 }
  0x38   : > { %p1596_p1 = por %p1595_p0, %p1594_p12 }
  0x39   : > { %p1590_p9 = pneg %p1589_p7 }
  0x3b   : > { %p1597_p4 = pnand %p1596_p1, %p1590_p9 }
  0x3d   : > { %1600 = shalt.err (!%p1597_p4)
}
  0x3e   : > { %1452 = dma.hbm_to_vmem [thread:$0]  (!%p1812_p11), %s2086_s2, 16, %s1816_s29, [#allocation7]  }
  0x3f   : > { %s39_s25 = sadd.s32 1, %s1713_s16  ;;  %s48_s28 = sadd.s32 1, %s1705_s14 }
  0x40   : > { %p41_p13 = scmp.ge.s32.totalorder %s39_s25, 2  ;;  %p55_p6 = scmp.ne.s32.totalorder %s1705_s14, %s1701_s13 }
  0x41   : > { %p56_p10 = scmp.eq.s32.totalorder %s1717_s17, 0  ;;  %p1463_p3 = scmp.lt.s32.totalorder %s1717_s17, 2 }
  0x42   : > { %s2111_s25 = smov (%p41_p13, %s39_s25), 0  ;;  %p1884_p7 = por %p1785_p2, %p55_p6 }
  0x43   : > { %p57_p5 = por %p56_p10, %p55_p6  ;;  %s43_s30 = ssub.s32 %s1713_s16, %s2111_s25 }
  0x44   : > { %s2098_s27 = scalar_select %p1884_p7, 1, 0 }
  0x45   : > { %s197_s4 = sand.u32 1, %s1705_s14   ;;  %p46_p9 = scmp.eq.s32.totalorder %s43_s30, 0 }
  0x46   : > { %s1147_s29 = sshll.u32 %s197_s4, 7  ;;  %s1217_s5 = sshll.u32 %s1713_s16, 11 }
  0x47   : > { %s1893_s6 = scalar_select %p46_p9, %s1705_s14, %s48_s28  }
  0x48   : > { %s1898_s26 = scalar_lea.hbm %s2084_s0, %s1217_s5  ;;  %s201_s21 = scalar_lea.vmem [#allocation3], %s1147_s29 }
  0x49   : > { %s209_s9 = sshll.u32 %s201_s21, 4  ;;  %p1902_p2 = pnand %p1463_p3, %p57_p5  ;;  %s1906_s9 = int_to_ptr.vmem [resolvable:$true] %s209_s9 }
  0x4a   : > { %s1908_s19 = scalar_lea.sflag [#allocation4], %s197_s4  ;;  %s1601_s28 = scalar_lea.hbm %s1898_s26, 2048 }
  0x4b   : > { %p1602_p11 = scmp.ne.s32.totalorder %s1898_s26, %s1601_s28  ;;  %p1603_p12 = pneg %p1902_p2 }
  0x4c   : > { %s1606_s5 = scalar_lea.hbm %s2084_s0, 4096  ;;  %p1607_p4 = scmp.lt.u32.totalorder %s1898_s26, %s2084_s0 }
  0x4d   : > { %p1604_p0 = pnand %p1603_p12, %p1602_p11  ;;  %p1608_p13 = scmp.lt.u32.totalorder %s1606_s5, %s1601_s28 }
  0x4e   : > { %p1610_p10 = scmp.lt.u32.totalorder %s1601_s28, %s1898_s26 }
  0x4f   : > { %p1605_p1 = pneg %p1604_p0  ;;  %p1609_p6 = por %p1608_p13, %p1607_p4 }
  0x51   : > { %p1611_p3 = por %p1610_p10, %p1609_p6 }
  0x53   : > { %p1612_p5 = pnand %p1611_p3, %p1605_p1 }
  0x55   : > { %1615 = shalt.err (!%p1612_p5)
}
  0x56   : > { %s1616_s4 = scalar_lea.vmem %s1906_s9, 2048  ;;  %s1723_s21 = smov [#allocation3]  }
  0x57   : > { %p1617_p9 = scmp.ne.s32.totalorder %s1906_s9, %s1616_s4  ;;  %s1621_s30 = sshll.u32 %s1723_s21, 4  ;;  %s1622_s30 = int_to_ptr.vmem [resolvable:$false] %s1621_s30 }
  0x58   : > { %s1623_s29 = scalar_lea.vmem %s1622_s30, 4096  ;;  %p1624_p7 = scmp.lt.s32.totalorder %s1906_s9, %s1622_s30 }
  0x59   : > { %p1619_p11 = pnand %p1617_p9, %p1603_p12  ;;  %p1625_p4 = scmp.lt.s32.totalorder %s1623_s29, %s1616_s4 }
  0x5b   : > { %p1620_p0 = pneg %p1619_p11  ;;  %p1626_p13 = por %p1625_p4, %p1624_p7 }
  0x5d   : > { %p1627_p6 = pnand %p1626_p13, %p1620_p0 }
  0x5f   : > { %1630 = shalt.err (!%p1627_p6)
}
  0x60   : > { %1456 = dma.hbm_to_vmem [thread:$0]  (!%p1902_p2), %s1898_s26, 2048, %s1906_s9, %s1908_s19, %s1721_s11, %s1721_s11, %s1722_s18  }
  0x61   : > { %221 = sbr.rel (%p1801_p8) target bundleno = 401 (0x191), region = 32  ;;  %s1942_s28 = sand.u32 (!%p1801_p8), 1, %s1701_s13  }
  0x62   : > { %s1151_s5 = sshll.u32 (!%p1801_p8), %s1942_s28, 7  ;;  %s224_s7 = scalar_lea.sflag (!%p1801_p8), [#allocation4], %s1942_s28 }
  0x63   : > { %s1948_s10 = scalar_lea.vmem (!%p1801_p8), [#allocation3], %s1151_s5  ;;  %p2100_p7 = scmp.ne.s32.totalorder (!%p1801_p8), %s2094_s22, 0 }
  0x68   : > { %1684 = dma.done.wait (%p2100_p7), %s224_s7, 2048  }
  0x69   : > { %1686 = vsyncadd (%p2100_p7), %s224_s7, 4294965248  ;;  %p2101_p2 = scmp.ne.s32.totalorder %s2092_s20, 0 }
  0x6b   : > { %1688 = dma.done.wait (%p2101_p2), [#allocation7], 1040  }
  0x6c   : > { %1690 = vsyncadd (%p2101_p2), [#allocation7], 4294966256  ;;  %v1521_v0 = vld [vmem:[#allocation6] sm:$0xff]   ;;  %v1522_v1 = vld [vmem:[#allocation6 + $0x8] sm:$0xff]   ;;  %s1986_s20 = scalar_lea.vmem [#allocation9], %s1151_s5  ;;  %s1250_s22 = sshll.u32 %s1709_s15, 11 }
  0x6d   : > { %1370 = vmatprep.subr.bf16.mxu0 %v1521_v0  ;;  %1418 = vmatprep.subr.bf16.mxu1 %v1521_v0  ;;  %v1523_v2 = vld [vmem:[#allocation6 + $0x10] sm:$0xff]   ;;  %v1524_v3 = vld [vmem:[#allocation6 + $0x18] sm:$0xff]   ;;  %v1529_v4 = vld [vmem:[%s1948_s10] sm:$0xff]   ;;  %s1028_s24 = sshll.u32 %s1986_s20, 4  ;;  %s2029_s15 = scalar_lea.hbm %s2087_s3, %s1250_s22  ;;  %s2031_s24 = int_to_ptr.vmem [resolvable:$true] %s1028_s24 }
  0x6e   : > { %1371 = vmatpush3.bf16.msra.mxu0 %v1521_v0  ;;  %1426 = vmatpush3.bf16.msra.mxu1 %v1521_v0  ;;  %v1530_v5 = vld [vmem:[%s1948_s10 + $0x40] sm:$0xff]   ;;  %v1526_v7 = vld [vmem:[#allocation6 + $0x28] sm:$0xff]   ;;  %v1527_v8 = vld [vmem:[#allocation6 + $0x30] sm:$0xff]   ;;  %s1014_s26 = scalar_lea.sflag [#allocation5], %s1942_s28  ;;  %s1631_s9 = scalar_lea.vmem %s2031_s24, 2048 }
  0x6f   : > { %1372 = vmatprep.subr.bf16.mxu0 %v1522_v1  ;;  %1419 = vmatprep.subr.bf16.mxu1 %v1522_v1  ;;  %v1525_v6 = vld [vmem:[#allocation6 + $0x20] sm:$0xff]   ;;  %v1528_v9 = vld [vmem:[#allocation6 + $0x38] sm:$0xff]   ;;  %v1531_v10 = vld [vmem:[%s1948_s10 + $0x8] sm:$0xff]   ;;  %p1632_p8 = scmp.ne.s32.totalorder %s2031_s24, %s1631_s9  ;;  %p2102_p12 = scmp.ne.s32.totalorder %s2098_s27, 0 }
  0x70   : > { %1386 = vmatprep.mubr.bf16.mxu0 %v1529_v4  ;;  %1402 = vmatprep.mubr.bf16.mxu1 %v1530_v5  ;;  %v1532_v11 = vld [vmem:[%s1948_s10 + $0x48] sm:$0xff]   ;;  %v1533_v12 = vld [vmem:[%s1948_s10 + $0x10] sm:$0xff]   ;;  %v1535_v14 = vld [vmem:[%s1948_s10 + $0x18] sm:$0xff]   ;;  %s1724_s19 = smov [#allocation9]  }
  0x71   : > { %v1534_v13 = vld [vmem:[%s1948_s10 + $0x50] sm:$0xff]   ;;  %v1536_v15 = vld [vmem:[%s1948_s10 + $0x58] sm:$0xff]   ;;  %v1537_v16 = vld [vmem:[%s1948_s10 + $0x20] sm:$0xff]   ;;  %p1633_p1 = pnand %p1632_p8, %p2102_p12  ;;  %s1635_s8 = sshll.u32 %s1724_s19, 4  ;;  %s1636_s8 = int_to_ptr.vmem [resolvable:$false] %s1635_s8 }
  0x72   : > { %1373 = vmatpush3.bf16.msra.mxu0 %v1522_v1  ;;  %1427 = vmatpush3.bf16.msra.mxu1 %v1522_v1  ;;  %v1538_v17 = vld [vmem:[%s1948_s10 + $0x60] sm:$0xff]   ;;  %v1539_v18 = vld [vmem:[%s1948_s10 + $0x28] sm:$0xff]   ;;  %v1541_v20 = vld [vmem:[%s1948_s10 + $0x30] sm:$0xff]   ;;  %s1637_s4 = scalar_lea.vmem %s1636_s8, 4096  ;;  %p1638_p3 = scmp.lt.s32.totalorder %s2031_s24, %s1636_s8 }
  0x73   : > { %1374 = vmatprep.subr.bf16.mxu0 %v1523_v2  ;;  %1420 = vmatprep.subr.bf16.mxu1 %v1523_v2  ;;  %v1540_v19 = vld [vmem:[%s1948_s10 + $0x68] sm:$0xff]   ;;  %v1542_v21 = vld [vmem:[%s1948_s10 + $0x70] sm:$0xff]   ;;  %v1543_v22 = vld [vmem:[%s1948_s10 + $0x38] sm:$0xff]   ;;  %p1634_p10 = pneg %p1633_p1  ;;  %p1639_p5 = scmp.lt.s32.totalorder %s1637_s4, %s1631_s9 }
  0x74   : > { %v1544_v23 = vld [vmem:[%s1948_s10 + $0x78] sm:$0xff]   ;;  %v1974_v24 = vld [vmem:[#allocation8] ss:$0 sm:$0xff] }
  0x75   : > { %p1640_p9 = por %p1639_p5, %p1638_p3 }
  0x76   : > { %1375 = vmatpush3.bf16.msra.mxu0 %v1523_v2  ;;  %1428 = vmatpush3.bf16.msra.mxu1 %v1523_v2 }
  0x77   : > { %1376 = vmatprep.subr.bf16.mxu0 %v1524_v3  ;;  %1421 = vmatprep.subr.bf16.mxu1 %v1524_v3  ;;  %p1641_p11 = pnand %p1640_p9, %p1634_p10 }
  0x7a   : > { %1377 = vmatpush3.bf16.msra.mxu0 %v1524_v3  ;;  %1429 = vmatpush3.bf16.msra.mxu1 %v1524_v3 }
  0x7b   : > { %1378 = vmatprep.subr.bf16.mxu0 %v1525_v6  ;;  %1422 = vmatprep.subr.bf16.mxu1 %v1525_v6 }
  0x7e   : > { %1379 = vmatpush3.bf16.msra.mxu0 %v1525_v6  ;;  %1430 = vmatpush3.bf16.msra.mxu1 %v1525_v6 }
  0x7f   : > { %1380 = vmatprep.subr.bf16.mxu0 %v1526_v7  ;;  %1423 = vmatprep.subr.bf16.mxu1 %v1526_v7 }
  0x82   : > { %1381 = vmatpush3.bf16.msra.mxu0 %v1526_v7  ;;  %1431 = vmatpush3.bf16.msra.mxu1 %v1526_v7 }
  0x83   : > { %1382 = vmatprep.subr.bf16.mxu0 %v1527_v8  ;;  %1424 = vmatprep.subr.bf16.mxu1 %v1527_v8 }
  0x86   : > { %1383 = vmatpush3.bf16.msra.mxu0 %v1527_v8  ;;  %1432 = vmatpush3.bf16.msra.mxu1 %v1527_v8 }
  0x87   : > { %1384 = vmatprep.subr.bf16.mxu0 %v1528_v9  ;;  %1425 = vmatprep.subr.bf16.mxu1 %v1528_v9 }
  0x8a   : > { %1385 = vmatpush3.bf16.msra.mxu0 %v1528_v9  ;;  %1433 = vmatpush3.bf16.msra.mxu1 %v1528_v9 }
  0x8d   : > { %1387 = vmatmul.mubr.bf16.vlgmr.msra.gmra.mrb[0].mxu0 %v1531_v10  ;;  %1403 = vmatmul.mubr.bf16.vlgmr.msra.gmra.mrb[0].mxu1 %v1532_v11 }
  0x8e   : > { %1390 = vmatprep.mubr.bf16.mxu0 %v1533_v12  ;;  %1406 = vmatprep.mubr.bf16.mxu1 %v1534_v13 }
  0x95   : > { %1391 = vmatmul.mubr.bf16.gmra.mrb[4].mxu0 %v1535_v14  ;;  %1407 = vmatmul.mubr.bf16.gmra.mrb[4].mxu1 %v1536_v15 }
  0x96   : > { %1394 = vmatprep.mubr.bf16.mxu0 %v1537_v16  ;;  %1410 = vmatprep.mubr.bf16.mxu1 %v1538_v17 }
  0x9d   : > { %1395 = vmatmul.mubr.bf16.gmra.mrb[8].mxu0 %v1539_v18  ;;  %1411 = vmatmul.mubr.bf16.gmra.mrb[8].mxu1 %v1540_v19 }
  0x9e   : > { %1398 = vmatprep.mubr.bf16.mxu0 %v1541_v20  ;;  %1414 = vmatprep.mubr.bf16.mxu1 %v1542_v21 }
  0xa5   : > { %1399 = vmatmul.mubr.bf16.gmra.mrb[12].mxu0 %v1543_v22  ;;  %1415 = vmatmul.mubr.bf16.gmra.mrb[12].mxu1 %v1544_v23 }
 0x160   : > { %v1388_v25 = vpop.f32.mrb[0].mxu0  ;;  %v1404_v26 = vpop.f32.mrb[0].mxu1 }
 0x161   : > { %v791_v27 = vadd.f32 %v1388_v25, %v1974_v24  ;;  %v807_v28 = vadd.f32 %v1404_v26, %v1974_v24  ;;  %v556_v29 = vpop.f32.mrb[1].mxu0  ;;  %v620_v30 = vpop.f32.mrb[1].mxu1 }
 0x162   : > { %v789_v31 = vadd.f32 %v1974_v24, %v556_v29  ;;  %v805_v32 = vadd.f32 %v1974_v24, %v620_v30  ;;  %v1389_v33 = vpop.f32.mrb[2].mxu0  ;;  %v1405_v34 = vpop.f32.mrb[2].mxu1 }
 0x163   : > { %v792_v35 = vadd.f32 %v1389_v33, %v1974_v24  ;;  %v808_v36 = vadd.f32 %v1405_v34, %v1974_v24  ;;  %v559_v37 = vpop.f32.mrb[3].mxu0  ;;  %v623_v38 = vpop.f32.mrb[3].mxu1  ;;  %v823_v41 = vmax.f32 %v791_v27, 0.0  ;;  %v839_v42 = vmax.f32 %v807_v28, 0.0 }
 0x164   : > { %v790_v39 = vadd.f32 %v1974_v24, %v559_v37  ;;  %v806_v40 = vadd.f32 %v1974_v24, %v623_v38  ;;  %v821_v45 = vmax.f32 %v789_v31, 0.0  ;;  %v837_v46 = vmax.f32 %v805_v32, 0.0 }
 0x165   : > { %v824_v43 = vmax.f32 %v792_v35, 0.0  ;;  %v840_v44 = vmax.f32 %v808_v36, 0.0 }
 0x166   : > { %v822_v47 = vmax.f32 %v790_v39, 0.0  ;;  %v838_v48 = vmax.f32 %v806_v40, 0.0 }
 0x167   : > { %v1259_v49 = vpack.c.bf16 %v824_v43, %v823_v41  ;;  %v1299_v50 = vpack.c.bf16 %v840_v44, %v839_v42 }
 0x168   : > { %v1254_v51 = vpack.c.bf16 %v822_v47, %v821_v45  ;;  %v1294_v52 = vpack.c.bf16 %v838_v48, %v837_v46  ;;  %v1392_v53 = vpop.f32.mrb[4].mxu0  ;;  %v1408_v54 = vpop.f32.mrb[4].mxu1 }
 0x169   : > { %1331 = vst [vmem:[%s1986_s20 + $0x8] sm:$0xff] %v1259_v49   ;;  %1339 = vst [vmem:[%s1986_s20 + $0x48] sm:$0xff] %v1299_v50   ;;  %v795_v55 = vadd.f32 %v1392_v53, %v1974_v24  ;;  %v811_v56 = vadd.f32 %v1408_v54, %v1974_v24  ;;  %v572_v57 = vpop.f32.mrb[5].mxu0  ;;  %v636_v58 = vpop.f32.mrb[5].mxu1 }
 0x16a   : > { %1255 = vst [vmem:[%s1986_s20] sm:$0xff] %v1254_v51   ;;  %1338 = vst [vmem:[%s1986_s20 + $0x40] sm:$0xff] %v1294_v52   ;;  %v793_v59 = vadd.f32 %v1974_v24, %v572_v57  ;;  %v809_v60 = vadd.f32 %v1974_v24, %v636_v58  ;;  %v1393_v61 = vpop.f32.mrb[6].mxu0  ;;  %v1409_v62 = vpop.f32.mrb[6].mxu1 }
 0x16b   : > { %v796_v63 = vadd.f32 %v1393_v61, %v1974_v24  ;;  %v812_v0 = vadd.f32 %v1409_v62, %v1974_v24  ;;  %v575_v1 = vpop.f32.mrb[7].mxu0  ;;  %v639_v2 = vpop.f32.mrb[7].mxu1  ;;  %v827_v5 = vmax.f32 %v795_v55, 0.0  ;;  %v843_v6 = vmax.f32 %v811_v56, 0.0 }
 0x16c   : > { %v794_v3 = vadd.f32 %v1974_v24, %v575_v1  ;;  %v810_v4 = vadd.f32 %v1974_v24, %v639_v2  ;;  %v825_v9 = vmax.f32 %v793_v59, 0.0  ;;  %v841_v10 = vmax.f32 %v809_v60, 0.0 }
 0x16d   : > { %v828_v7 = vmax.f32 %v796_v63, 0.0  ;;  %v844_v8 = vmax.f32 %v812_v0, 0.0 }
 0x16e   : > { %v826_v11 = vmax.f32 %v794_v3, 0.0  ;;  %v842_v12 = vmax.f32 %v810_v4, 0.0 }
 0x16f   : > { %v1269_v13 = vpack.c.bf16 %v828_v7, %v827_v5  ;;  %v1309_v14 = vpack.c.bf16 %v844_v8, %v843_v6 }
 0x170   : > { %v1264_v15 = vpack.c.bf16 %v826_v11, %v825_v9  ;;  %v1304_v16 = vpack.c.bf16 %v842_v12, %v841_v10  ;;  %v1396_v17 = vpop.f32.mrb[8].mxu0  ;;  %v1412_v18 = vpop.f32.mrb[8].mxu1 }
 0x171   : > { %1333 = vst [vmem:[%s1986_s20 + $0x18] sm:$0xff] %v1269_v13   ;;  %1341 = vst [vmem:[%s1986_s20 + $0x58] sm:$0xff] %v1309_v14   ;;  %v799_v19 = vadd.f32 %v1396_v17, %v1974_v24  ;;  %v815_v20 = vadd.f32 %v1412_v18, %v1974_v24  ;;  %v588_v21 = vpop.f32.mrb[9].mxu0  ;;  %v652_v22 = vpop.f32.mrb[9].mxu1 }
 0x172   : > { %1332 = vst [vmem:[%s1986_s20 + $0x10] sm:$0xff] %v1264_v15   ;;  %1340 = vst [vmem:[%s1986_s20 + $0x50] sm:$0xff] %v1304_v16   ;;  %v797_v23 = vadd.f32 %v1974_v24, %v588_v21  ;;  %v813_v25 = vadd.f32 %v1974_v24, %v652_v22  ;;  %v1397_v26 = vpop.f32.mrb[10].mxu0  ;;  %v1413_v27 = vpop.f32.mrb[10].mxu1 }
 0x173   : > { %v800_v28 = vadd.f32 %v1397_v26, %v1974_v24  ;;  %v816_v29 = vadd.f32 %v1413_v27, %v1974_v24  ;;  %v591_v30 = vpop.f32.mrb[11].mxu0  ;;  %v655_v31 = vpop.f32.mrb[11].mxu1  ;;  %v831_v34 = vmax.f32 %v799_v19, 0.0  ;;  %v847_v35 = vmax.f32 %v815_v20, 0.0 }
 0x174   : > { %v798_v32 = vadd.f32 %v1974_v24, %v591_v30  ;;  %v814_v33 = vadd.f32 %v1974_v24, %v655_v31  ;;  %v829_v38 = vmax.f32 %v797_v23, 0.0  ;;  %v845_v39 = vmax.f32 %v813_v25, 0.0 }
 0x175   : > { %v832_v36 = vmax.f32 %v800_v28, 0.0  ;;  %v848_v37 = vmax.f32 %v816_v29, 0.0 }
 0x176   : > { %v830_v40 = vmax.f32 %v798_v32, 0.0  ;;  %v846_v41 = vmax.f32 %v814_v33, 0.0 }
 0x177   : > { %v1279_v42 = vpack.c.bf16 %v832_v36, %v831_v34  ;;  %v1319_v43 = vpack.c.bf16 %v848_v37, %v847_v35 }
 0x178   : > { %v1274_v44 = vpack.c.bf16 %v830_v40, %v829_v38  ;;  %v1314_v45 = vpack.c.bf16 %v846_v41, %v845_v39  ;;  %v1400_v46 = vpop.f32.mrb[12].mxu0  ;;  %v1416_v47 = vpop.f32.mrb[12].mxu1 }
 0x179   : > { %1335 = vst [vmem:[%s1986_s20 + $0x28] sm:$0xff] %v1279_v42   ;;  %1343 = vst [vmem:[%s1986_s20 + $0x68] sm:$0xff] %v1319_v43   ;;  %v803_v48 = vadd.f32 %v1400_v46, %v1974_v24  ;;  %v819_v49 = vadd.f32 %v1416_v47, %v1974_v24  ;;  %v604_v50 = vpop.f32.mrb[13].mxu0  ;;  %v668_v51 = vpop.f32.mrb[13].mxu1 }
 0x17a   : > { %1334 = vst [vmem:[%s1986_s20 + $0x20] sm:$0xff] %v1274_v44   ;;  %1342 = vst [vmem:[%s1986_s20 + $0x60] sm:$0xff] %v1314_v45   ;;  %v801_v52 = vadd.f32 %v1974_v24, %v604_v50  ;;  %v817_v53 = vadd.f32 %v1974_v24, %v668_v51  ;;  %v1401_v54 = vpop.f32.mrb[14].mxu0  ;;  %v1417_v55 = vpop.f32.mrb[14].mxu1 }
 0x17b   : > { %v804_v56 = vadd.f32 %v1401_v54, %v1974_v24  ;;  %v820_v57 = vadd.f32 %v1417_v55, %v1974_v24  ;;  %v607_v58 = vpop.f32.mrb[15].mxu0  ;;  %v671_v59 = vpop.f32.mrb[15].mxu1  ;;  %v835_v62 = vmax.f32 %v803_v48, 0.0  ;;  %v851_v63 = vmax.f32 %v819_v49, 0.0 }
 0x17c   : > { %v802_v60 = vadd.f32 %v1974_v24, %v607_v58  ;;  %v818_v61 = vadd.f32 %v1974_v24, %v671_v59  ;;  %v833_v2 = vmax.f32 %v801_v52, 0.0  ;;  %v849_v3 = vmax.f32 %v817_v53, 0.0 }
 0x17d   : > { %v836_v0 = vmax.f32 %v804_v56, 0.0  ;;  %v852_v1 = vmax.f32 %v820_v57, 0.0 }
 0x17e   : > { %v834_v4 = vmax.f32 %v802_v60, 0.0  ;;  %v850_v5 = vmax.f32 %v818_v61, 0.0 }
 0x17f   : > { %v1289_v6 = vpack.c.bf16 %v836_v0, %v835_v62  ;;  %v1329_v7 = vpack.c.bf16 %v852_v1, %v851_v63 }
 0x180   : > { %v1284_v24 = vpack.c.bf16 %v834_v4, %v833_v2  ;;  %v1324_v8 = vpack.c.bf16 %v850_v5, %v849_v3 }
 0x181   : > { %1337 = vst [vmem:[%s1986_s20 + $0x38] sm:$0xff] %v1289_v6   ;;  %1345 = vst [vmem:[%s1986_s20 + $0x78] sm:$0xff] %v1329_v7  }
 0x182   : > { %1336 = vst [vmem:[%s1986_s20 + $0x30] sm:$0xff] %v1284_v24   ;;  %1344 = vst [vmem:[%s1986_s20 + $0x70] sm:$0xff] %v1324_v8  }
 0x183   : > { %1644 = shalt.err (!%p1641_p11)
}
 0x184   : > { %s1645_s21 = scalar_lea.hbm %s2029_s15, 2048  ;;  %s1649_s5 = scalar_lea.hbm %s2087_s3, 4096 }
 0x185   : > { %p1646_p0 = scmp.ne.s32.totalorder %s2029_s15, %s1645_s21  ;;  %p1650_p6 = scmp.lt.u32.totalorder %s2029_s15, %s2087_s3 }
 0x186   : > { %p1651_p7 = scmp.lt.u32.totalorder %s1649_s5, %s1645_s21  ;;  %p1653_p8 = scmp.lt.u32.totalorder %s1645_s21, %s2029_s15 }
 0x187   : > { %p1647_p4 = pnand %p1646_p0, %p2102_p12 }
 0x188   : > { %p1652_p2 = por %p1651_p7, %p1650_p6 }
 0x189   : > { %p1648_p13 = pneg %p1647_p4 }
 0x18a   : > { %p1654_p1 = por %p1653_p8, %p1652_p2 }
 0x18c   : > { %p1655_p10 = pnand %p1654_p1, %p1648_p13 }
 0x18e   : > { %1658 = shalt.err (!%p1655_p10)
}
 0x18f   : > { %s1725_s20 = smov 64   ;;  %s1726_s22 = smov 4  }
 0x190   : > { %1444 = dma.vmem_to_hbm [thread:$0]  (%p2102_p12), %s2031_s24, 2048, %s2029_s15, %s1014_s26, %s1725_s20, %s1725_s20, %s1726_s22  }
 0x191 PF: > { %s1043_s11 = sand.u32 1, %s1697_s12   ;;  %p2103_p3 = scmp.ne.s32.totalorder %s2095_s23, 0 }
 0x192   : > { %p2104_p5 = scmp.ge.s32.totalorder %s1717_s17, 2  ;;  %s1044_s18 = scalar_lea.sflag [#allocation5], %s1043_s11 }
 0x194   : > { %p1458_p9 = pnand %p2104_p5, %p2103_p3 }
 0x196   : > { %1692 = dma.done.wait (!%p1458_p9), %s1044_s18, 2048  }
 0x197   : > { %1694 = vsyncadd (!%p1458_p9), %s1044_s18, 4294965248  ;;  %s20_s17 = sadd.s32 1, %s1717_s17   ;;  %s2105_s12 = smov %s1701_s13 }
 0x198   : > { %p17_p11 = scmp.ge.s32.totalorder %s20_s17, 4   ;;  %s2106_s13 = smov %s1705_s14 }
 0x199   : > { %s2107_s14 = smov %s1893_s6  ;;  %s2108_s15 = smov %s1713_s16 }
 0x19a   : > { %s2109_s16 = smov %s2111_s25  ;;  %19 = sbr.rel (!%p17_p11) target bundleno = 7 (0x7), region = 95 }
 0x1a1   :  { %1049 = vsyncpa [#allocation4], 1 }
 0x1a2   :  { %1051 = vsyncpa [#allocation4 + $0x1], 1 }
 0x1a3   :  { %1052 = vsyncpa [#allocation7], 1 }
 0x1a4   :  { %1053 = vsyncpa [#allocation5], 1 }
 0x1a5   :  { %1055 = vsyncpa [#allocation5 + $0x1], 1 }

</bundles_post_ra>
